<compile_context>
chip_gen: v5e
topology: v5e:2x2
jax: 0.10.0
libtpu: 0.0.40
codegen_flags: <defaults>
</compile_context>

<pallas_src>
import functools
import math

import jax
import jax.numpy as jnp
from jax.experimental import pallas as pl
from jax.experimental.pallas import tpu as pltpu


def _pool_concat_kernel(slow_ref, fast_ref, out_ref, *, n_slow_blk, alpha):
    # Block shapes (batch dim squeezed):
    #   slow_ref: (c_tile, t_tile, hw)
    #   fast_ref: (c_tile, t_tile, alpha, hw)
    #   out_ref : (c_tile, t_tile, hw)       -- one output channel block
    cb = pl.program_id(1)

    @pl.when(cb < n_slow_blk)
    def _():
        # Slow pathway: pure channel-slab pass-through.
        # TODO(synk): could bypass VMEM entirely (memory_space=pl.ANY + one
        # contiguous HBM->HBM make_async_copy per batch); kept on the
        # auto-pipelined path for simplicity -- HBM traffic is identical.
        out_ref[...] = slow_ref[...]

    @pl.when(cb >= n_slow_blk)
    def _():
        # Fast pathway: temporal AvgPool over the ALPHA axis.  Accumulate one
        # slice at a time in f32 (plain VPU adds; no full-block f32 copy, no
        # divide, no XLU reduce).
        acc = fast_ref[:, :, 0, :].astype(jnp.float32)
        for a in range(1, alpha):
            acc = acc + fast_ref[:, :, a, :].astype(jnp.float32)
        out_ref[...] = (acc * (1.0 / alpha)).astype(out_ref.dtype)


def _round_up(x, m):
    return ((x + m - 1) // m) * m


def _divisors_desc(x):
    return [d for d in range(x, 0, -1) if x % d == 0]


def _vmem_budget_bytes():
    """(double-buffered block budget, scoped VMEM limit) for this generation."""
    try:
        info = pltpu.get_tpu_info()
        cap = int(getattr(info, "vmem_capacity_bytes", 64 << 20))
    except Exception:
        cap = 64 << 20  # v7x per-TensorCore VMEM; conservative everywhere
    budget = max(int(cap * 0.35), 8 << 20)
    limit = max(int(cap * 0.70), 32 << 20)
    return budget, limit


def _choose_tiles(c_slow, c_fast, t_slow, hw, alpha, itemsize, budget_bytes):
    """Pick (c_tile, t_tile); H*W is always taken whole (lane axis)."""
    sub = {4: 8, 2: 16, 1: 32}.get(itemsize, 8)   # native sublane tile
    hw_pad = _round_up(hw, 128)
    a_pad = _round_up(alpha, sub)

    def footprint(c_t, t_t):
        t_pad = _round_up(t_t, sub)
        slow_and_out = 2 * c_t * t_pad * hw_pad
        fast = c_t * t_t * a_pad * hw_pad
        return 2 * (slow_and_out + fast) * itemsize   # x2: double buffering

    c_cands = _divisors_desc(math.gcd(c_slow, c_fast))
    # Full T first (one large contiguous DMA segment per channel), then
    # smaller sublane-aligned divisors (shrink T before HW; HW never shrinks).
    t_cands = [t_slow] + [d for d in _divisors_desc(t_slow)
                          if d != t_slow and d % sub == 0]
    for t_t in t_cands:
        for c_t in c_cands:
            if footprint(c_t, t_t) <= budget_bytes:
                return c_t, t_t
    return 1, t_cands[-1]


def pool_concat_pathway(x_slow, x_fast, alpha):
    """
    PoolConcatPathway forward for the canonical SlowFast fusion:
      x_slow: (N, C_s, T_s, H, W)   -- pool[0] = None (pass-through)
      x_fast: (N, C_f, T_f, H, W)   -- pool[1] = AvgPool3d((alpha,1,1), stride=(alpha,1,1))
    Returns (N, C_s + C_f, T_s, H, W) == torch.cat([slow, pooled_fast], dim=1).
    """
    n, c_s, t_s, h, w = x_slow.shape
    nf, c_f, t_f, hf, wf = x_fast.shape
    assert (n, h, w) == (nf, hf, wf)
    assert x_slow.dtype == x_fast.dtype
    t_pool = t_f // alpha
    assert t_pool == t_s, "pooled fast pathway must match slow temporal length"
    hw = h * w
    dtype = x_slow.dtype
    itemsize = jnp.dtype(dtype).itemsize

    # ---- Layout: native NCTHW; only free contiguous-dim reshapes ----------
    xs = x_slow.reshape(n, c_s, t_s, hw)
    xf = x_fast if t_f == t_s * alpha else x_fast[:, :, : t_s * alpha]
    xf = xf.reshape(n, c_f, t_s, alpha, hw)

    budget, vmem_limit = _vmem_budget_bytes()
    c_tile, t_tile = _choose_tiles(c_s, c_f, t_s, hw, alpha, itemsize, budget)
    n_slow_blk = c_s // c_tile
    n_fast_blk = c_f // c_tile
    grid = (n, n_slow_blk + n_fast_blk, t_s // t_tile)

    def slow_index(b, cb, tb):
        keep = cb < n_slow_blk          # pin to block 0 while the fast slab runs
        return b, jnp.where(keep, cb, 0), jnp.where(keep, tb, 0), 0

    def fast_index(b, cb, tb):
        keep = cb >= n_slow_blk         # pin to block 0 while the slow slab runs
        return (b, jnp.where(keep, cb - n_slow_blk, 0),
                jnp.where(keep, tb, 0), 0, 0)

    kernel = functools.partial(_pool_concat_kernel,
                               n_slow_blk=n_slow_blk, alpha=alpha)

    out = pl.pallas_call(
        kernel,
        out_shape=jax.ShapeDtypeStruct((n, c_s + c_f, t_s, hw), dtype),
        grid=grid,
        in_specs=[
            pl.BlockSpec((None, c_tile, t_tile, hw), slow_index),
            pl.BlockSpec((None, c_tile, t_tile, alpha, hw), fast_index),
        ],
        out_specs=pl.BlockSpec((None, c_tile, t_tile, hw),
                               lambda b, cb, tb: (b, cb, tb, 0)),
        compiler_params=pltpu.CompilerParams(
            dimension_semantics=("parallel", "parallel", "parallel"),
            vmem_limit_bytes=vmem_limit),
    )(xs, xf)

    # Free split of H*W back into (H, W); still NCTHW, no transpose.
    return out.reshape(n, c_s + c_f, t_s, h, w)


if __name__ == "__main__":
    key = jax.random.PRNGKey(0)
    k1, k2 = jax.random.split(key)

    N, ALPHA = 2, 4
    C_SLOW, C_FAST = 16, 8
    T_SLOW, H, W = 4, 16, 16
    T_FAST = T_SLOW * ALPHA

    x_slow = jax.random.normal(k1, (N, C_SLOW, T_SLOW, H, W), jnp.float32)
    x_fast = jax.random.normal(k2, (N, C_FAST, T_FAST, H, W), jnp.float32)

    out = pool_concat_pathway(x_slow, x_fast, ALPHA)
    out = jax.block_until_ready(out)

    # Pure-JAX reference with identical semantics to the PyTorch module.
    xf_ref = x_fast.reshape(N, C_FAST, T_SLOW, ALPHA, H, W).mean(axis=3)
    ref = jnp.concatenate([x_slow, xf_ref], axis=1)

    assert out.shape == (N, C_SLOW + C_FAST, T_SLOW, H, W), out.shape
    err = float(jnp.max(jnp.abs(out - ref)))
    assert err < 1e-5, f"max abs error {err}"

    print("KERNEL_OK")
</pallas_src>

<mosaic_0001>
module attributes {stable_mosaic.version = 11 : i64} {
  func.func @_pool_concat_kernel(%arg0: i32, %arg1: i32, %arg2: i32, %arg3: memref<1x8x4x256xf32, #tpu.memory_space<vmem>>, %arg4: memref<1x8x4x4x256xf32, #tpu.memory_space<vmem>>, %arg5: memref<1x8x4x256xf32, #tpu.memory_space<vmem>>) attributes {dimension_semantics = [#tpu.dimension_semantics<parallel>, #tpu.dimension_semantics<parallel>, #tpu.dimension_semantics<parallel>], iteration_bounds = array<i64: 2, 3, 1>, scalar_prefetch = 0 : i64, scratch_operands = 0 : i64, tpu.core_type = #tpu.core_type<tc>, window_params = [{transform_indices = @transform_0, window_bounds = array<i64: 1, 8, 4, 256>}, {transform_indices = @transform_1, window_bounds = array<i64: 1, 8, 4, 4, 256>}, {transform_indices = @transform_2, window_bounds = array<i64: 1, 8, 4, 256>}]} {
    %c2_i32 = arith.constant 2 : i32
    %0 = arith.cmpi slt, %arg1, %c2_i32 : i32
    %1 = arith.extui %0 : i1 to i32
    %c0_i32 = arith.constant 0 : i32
    %2 = arith.cmpi ne, %1, %c0_i32 : i32
    scf.if %2 {
      %c0 = arith.constant 0 : index
      %c0_2 = arith.constant 0 : index
      %c0_3 = arith.constant 0 : index
      %c0_4 = arith.constant 0 : index
      %6 = vector.load %arg3[%c0, %c0_2, %c0_3, %c0_4] : memref<1x8x4x256xf32, #tpu.memory_space<vmem>>, vector<1x8x4x256xf32>
      %7 = vector.shape_cast %6 : vector<1x8x4x256xf32> to vector<8x4x256xf32>
      %c0_5 = arith.constant 0 : index
      %c0_6 = arith.constant 0 : index
      %c0_7 = arith.constant 0 : index
      %c0_8 = arith.constant 0 : index
      %8 = vector.load %arg5[%c0_5, %c0_6, %c0_7, %c0_8] : memref<1x8x4x256xf32, #tpu.memory_space<vmem>>, vector<1x8x4x256xf32>
      %9 = vector.shape_cast %8 : vector<1x8x4x256xf32> to vector<8x4x256xf32>
      %10 = vector.shape_cast %7 : vector<8x4x256xf32> to vector<1x8x4x256xf32>
      tpu.vector_store %arg5[%c0_5, %c0_6, %c0_7, %c0_8], %10 {strides = array<i32>} : memref<1x8x4x256xf32, #tpu.memory_space<vmem>>, vector<1x8x4x256xf32>,
    } else {
    }
    %c2_i32_0 = arith.constant 2 : i32
    %3 = arith.cmpi sge, %arg1, %c2_i32_0 : i32
    %4 = arith.extui %3 : i1 to i32
    %c0_i32_1 = arith.constant 0 : i32
    %5 = arith.cmpi ne, %4, %c0_i32_1 : i32
    scf.if %5 {
      %c0 = arith.constant 0 : index
      %c0_2 = arith.constant 0 : index
      %c0_3 = arith.constant 0 : index
      %c0_4 = arith.constant 0 : index
      %c0_5 = arith.constant 0 : index
      %6 = vector.load %arg4[%c0, %c0_2, %c0_3, %c0_4, %c0_5] : memref<1x8x4x4x256xf32, #tpu.memory_space<vmem>>, vector<1x8x4x1x256xf32>
      %7 = vector.shape_cast %6 : vector<1x8x4x1x256xf32> to vector<8x4x256xf32>
      %c0_6 = arith.constant 0 : index
      %c0_7 = arith.constant 0 : index
      %c0_8 = arith.constant 0 : index
      %c1 = arith.constant 1 : index
      %c0_9 = arith.constant 0 : index
      %8 = vector.load %arg4[%c0_6, %c0_7, %c0_8, %c1, %c0_9] : memref<1x8x4x4x256xf32, #tpu.memory_space<vmem>>, vector<1x8x4x1x256xf32>
      %9 = vector.shape_cast %8 : vector<1x8x4x1x256xf32> to vector<8x4x256xf32>
      %10 = arith.addf %7, %9 : vector<8x4x256xf32>
      %c0_10 = arith.constant 0 : index
      %c0_11 = arith.constant 0 : index
      %c0_12 = arith.constant 0 : index
      %c2 = arith.constant 2 : index
      %c0_13 = arith.constant 0 : index
      %11 = vector.load %arg4[%c0_10, %c0_11, %c0_12, %c2, %c0_13] : memref<1x8x4x4x256xf32, #tpu.memory_space<vmem>>, vector<1x8x4x1x256xf32>
      %12 = vector.shape_cast %11 : vector<1x8x4x1x256xf32> to vector<8x4x256xf32>
      %13 = arith.addf %10, %12 : vector<8x4x256xf32>
      %c0_14 = arith.constant 0 : index
      %c0_15 = arith.constant 0 : index
      %c0_16 = arith.constant 0 : index
      %c3 = arith.constant 3 : index
      %c0_17 = arith.constant 0 : index
      %14 = vector.load %arg4[%c0_14, %c0_15, %c0_16, %c3, %c0_17] : memref<1x8x4x4x256xf32, #tpu.memory_space<vmem>>, vector<1x8x4x1x256xf32>
      %15 = vector.shape_cast %14 : vector<1x8x4x1x256xf32> to vector<8x4x256xf32>
      %16 = arith.addf %13, %15 : vector<8x4x256xf32>
      %cst = arith.constant 2.500000e-01 : f32
      %17 = vector.broadcast %cst : f32 to vector<8x4x256xf32>
      %18 = arith.mulf %16, %17 : vector<8x4x256xf32>
      %c0_18 = arith.constant 0 : index
      %c0_19 = arith.constant 0 : index
      %c0_20 = arith.constant 0 : index
      %c0_21 = arith.constant 0 : index
      %19 = vector.load %arg5[%c0_18, %c0_19, %c0_20, %c0_21] : memref<1x8x4x256xf32, #tpu.memory_space<vmem>>, vector<1x8x4x256xf32>
      %20 = vector.shape_cast %19 : vector<1x8x4x256xf32> to vector<8x4x256xf32>
      %21 = vector.shape_cast %18 : vector<8x4x256xf32> to vector<1x8x4x256xf32>
      tpu.vector_store %arg5[%c0_18, %c0_19, %c0_20, %c0_21], %21 {strides = array<i32>} : memref<1x8x4x256xf32, #tpu.memory_space<vmem>>, vector<1x8x4x256xf32>,
    } else {
    }
    return
  }
  func.func @transform_0(%arg0: i32, %arg1: i32, %arg2: i32) -> (i32, i32, i32, i32) {
    %c2_i32 = arith.constant 2 : i32
    %0 = arith.cmpi slt, %arg1, %c2_i32 : i32
    %c0_i32 = arith.constant 0 : i32
    %1 = arith.select %0, %arg1, %c0_i32 : i32
    %c0_i32_0 = arith.constant 0 : i32
    %2 = arith.select %0, %arg2, %c0_i32_0 : i32
    %c0_i32_1 = arith.constant 0 : i32
    %c0_i32_2 = arith.constant 0 : i32
    return %arg0, %1, %2, %c0_i32_1 : i32, i32, i32, i32
  }
  func.func @transform_1(%arg0: i32, %arg1: i32, %arg2: i32) -> (i32, i32, i32, i32, i32) {
    %c2_i32 = arith.constant 2 : i32
    %0 = arith.cmpi sge, %arg1, %c2_i32 : i32
    %c2_i32_0 = arith.constant 2 : i32
    %1 = arith.subi %arg1, %c2_i32_0 : i32
    %c0_i32 = arith.constant 0 : i32
    %2 = arith.select %0, %1, %c0_i32 : i32
    %c0_i32_1 = arith.constant 0 : i32
    %3 = arith.select %0, %arg2, %c0_i32_1 : i32
    %c0_i32_2 = arith.constant 0 : i32
    %c0_i32_3 = arith.constant 0 : i32
    %c0_i32_4 = arith.constant 0 : i32
    return %arg0, %2, %3, %c0_i32_2, %c0_i32_3 : i32, i32, i32, i32, i32
  }
  func.func @transform_2(%arg0: i32, %arg1: i32, %arg2: i32) -> (i32, i32, i32, i32) {
    %c0_i32 = arith.constant 0 : i32
    %c0_i32_0 = arith.constant 0 : i32
    return %arg0, %arg1, %arg2, %c0_i32 : i32, i32, i32, i32
  }
}

</mosaic_0001>

<bundles_post_ra>
// kernel: tpu_custom_call.1
= control target key start
LH: loop header
LB: loop body
LE: loop exit
PB: predicated region body
PF: predicated region fallthrough
CT: control target
= control target key end

     0   :  { %s1906_s0 = inlined_call_operand.hbm [shape: f32[2,16,4,256], index: 0, kind: input, shape index: {}]   ;;  %s1907_s1 = inlined_call_operand.hbm [shape: f32[2,8,4,4,256], index: 1, kind: input, shape index: {}]   ;;  %s1908_s2 = inlined_call_operand.hbm [shape: f32[2,24,4,256], index: 2, kind: output, shape index: {}]  }
   0x1   :  { %1918 = sst [smem:[#allocation20_spill]] %s1908_s2 }
   0x2   :  { %7 = vsyncpa [#allocation3], 0 }
   0x3   :  { %9 = vsyncpa [#allocation3 + $0x1], 0 }
   0x4   :  { %10 = vsyncpa [#allocation6], 0 }
   0x5   :  { %12 = vsyncpa [#allocation6 + $0x1], 0 }
   0x6   :  { %13 = vsyncpa [#allocation4], 0 }
   0x7   :  { %15 = vsyncpa [#allocation4 + $0x1], 0  ;;  %s1454_s9 = smov 0   ;;  %s1456_s10 = smov 0  }
   0x8   :  { %s1458_s11 = smov 0   ;;  %s1460_s12 = smov 0  }
   0x9   :  { %s1462_s13 = smov 0   ;;  %s1464_s14 = smov 0  }
   0xa   :  { %s1466_s15 = smov 0   ;;  %s1468_s16 = smov 0  }
   0xb   :  { %s1470_s17 = smov 0   ;;  %s1472_s18 = smov 0  }
   0xc   :  { %s1474_s19 = smov 0   ;;  %s1476_s20 = smov 0  }
   0xd   :  { %s1478_s21 = smov 0   ;;  %s1480_s22 = smov 0  }
   0xe LB: > { %1919 = sst [smem:[#allocation11_spill]] %s1381_s9  ;;  %s928_s23 = sadd.s32 4294967295, %s1433_s22   ;;  %s1433_s22 = sphi %s1480_s22, %s21_s22   ;;  %s1429_s21 = sphi %s1478_s21, %s1963_s21   ;;  %s1425_s20 = sphi %s1476_s20, %s1962_s20   ;;  %s1421_s19 = sphi %s1474_s19, %s1961_s19   ;;  %s1417_s18 = sphi %s1472_s18, %s1960_s18   ;;  %s1413_s17 = sphi %s1470_s17, %s1959_s17   ;;  %s1409_s16 = sphi %s1468_s16, %s1958_s16   ;;  %s1405_s15 = sphi %s1466_s15, %s1957_s15   ;;  %s1401_s14 = sphi %s1464_s14, %s1956_s14   ;;  %s1397_s13 = sphi %s1462_s13, %s1955_s13   ;;  %s1393_s12 = sphi %s1460_s12, %s1954_s12   ;;  %s1389_s11 = sphi %s1458_s11, %s1947_s11   ;;  %s1385_s10 = sphi %s1456_s10, %s1953_s10   ;;  %s1381_s9 = sphi %s1454_s9, %s1952_s9  }
   0xf   : > { %1920 = sst [smem:[#allocation12_spill]] %s1389_s11  ;;  %s36_s25 = sadd.s32 1, %s1425_s20 }
  0x10   : > { %1921 = sst [smem:[#allocation13_spill]] %s1413_s17  ;;  %s40_s26 = sadd.s32 1, %s1429_s21 }
  0x11   : > { %1922 = sst [smem:[#allocation14_spill]] %s1421_s19  ;;  %p38_p0 = scmp.ge.s32.totalorder %s36_s25, 3 }
  0x12   : > { %p44_p1 = scmp.lt.s32.totalorder %s1425_s20, 2  ;;  %s57_s27 = sadd.s32 1, %s1413_s17 }
  0x13   : > { %p64_p2 = scmp.ne.s32.totalorder %s1413_s17, %s1409_s16  ;;  %s1965_s25 = smov (%p38_p0, %s36_s25), 0 }
  0x14   : > { %s1967_s26 = smov (!%p38_p0, %s40_s26), %s1429_s21  ;;  %p47_p4 = scmp.lt.s32.totalorder %s1965_s25, 2 }
  0x15   : > { %s1536_s28 = scalar_select %p44_p1, %s1425_s20, 0 }
  0x16   : > { %p42_p3 = scmp.ge.s32.totalorder %s1967_s26, 2  ;;  %p65_p5 = scmp.eq.s32.totalorder %s1433_s22, 0 }
  0x17   : > { %p70_p6 = scmp.ne.s32.totalorder %s1409_s16, %s1405_s15  ;;  %p1558_p8 = scmp.eq.s32.totalorder %s928_s23, 0 }
  0x18   : > { %s1969_s26 = smov (%p42_p3, %s1967_s26), 0  ;;  %p1551_p7 = por %p65_p5, %p64_p2 }
  0x19   : > { %1923 = sst [smem:[#allocation15_spill]] %s1969_s26  ;;  %s1547_s30 = ssub.s32 %s1429_s21, %s1969_s26 }
  0x1a   : > { %s48_s29 = scalar_select %p47_p4, %s1965_s25, 0 }
  0x1b   : > { %s119_s7 = ssub.s32 %s1425_s20, %s1965_s25  ;;  %p1567_p10 = por %p1558_p8, %p70_p6 }
  0x1c   : > { %s51_s4 = ssub.s32 %s1536_s28, %s48_s29  ;;  %s120_s15 = sor.u32 %s119_s7, %s1547_s30 }
  0x1d   : > { %s52_s6 = sor.u32 %s51_s4, %s1547_s30  ;;  %s125_s29 = sadd.s32 1, %s1389_s11 }
  0x1e   : > { %p55_p9 = scmp.eq.s32.totalorder %s52_s6, 0  ;;  %p123_p11 = scmp.eq.s32.totalorder %s120_s15, 0 }
  0x1f   : > { %p135_p12 = scmp.ne.s32.totalorder %s1389_s11, %s1385_s10  ;;  %p136_p13 = scmp.eq.s32.totalorder %s928_s23, 5 }
  0x20   : > { %s1574_s24 = scalar_select %p55_p9, %s1413_s17, %s57_s27  }
  0x21   : > { %p141_p0 = scmp.ne.s32.totalorder %s1385_s10, %s1381_s9  ;;  %p1585_p1 = por %p136_p13, %p135_p12 }
  0x22   : > { %1927 = sst [smem:[#allocation16_spill]] %s1574_s24  ;;  %s1931_s26 = sadd.s32 4294967294, %s1433_s22  }
  0x23   : > { %s1583_s4 = scalar_select %p123_p11, %s1389_s11, %s125_s29  }
  0x24   : > { %s1929_s6 = scalar_select %p1585_p1, 1, 0 }
  0x25   : > { %1928 = sst [smem:[#allocation17_spill]] %s1583_s4  ;;  %p142_p2 = scmp.eq.s32.totalorder %s1931_s26, 5 }
  0x26   : > { %1930 = sst [smem:[#allocation18_spill]] %s1929_s6  ;;  %p1105_p3 = scmp.lt.s32.totalorder %s1433_s22, 6 }
  0x27   : > { %p1592_p4 = por %p142_p2, %p141_p0  ;;  %s162_s27 = sand.u32 1, %s1413_s17  }
  0x28   : > { %s934_s15 = sshll.u32 %s162_s27, 6  ;;  %s1084_s24 = sshll.u32 %s1536_s28, 4 }
  0x29   : > { %s1932_s7 = scalar_select %p1592_p4, 1, 0 }
  0x2a   : > { %s937_s23 = sshll.u32 %s1429_s21, 5  ;;  %s166_s2 = scalar_lea.vmem [#allocation2], %s934_s15 }
  0x2b   : > { %1933 = sst [smem:[#allocation19_spill]] %s1932_s7  ;;  %s182_s19 = sshll.u32 %s166_s2, 4  ;;  %s183_s19 = int_to_ptr.vmem [resolvable:$true] %s182_s19 }
  0x2c   : > { %s177_s9 = sadd.s32 %s1084_s24, %s937_s23  ;;  %p1603_p6 = pnand %p1105_p3, %p1551_p7 }
  0x2d   : > { %s938_s29 = sshll.u32 %s177_s9, 2  ;;  %s163_s28 = scalar_lea.sflag [#allocation3], %s162_s27 }
  0x2e   : > { %s179_s7 = scalar_lea.hbm %s1906_s0, %s938_s29  ;;  %p1227_p11 = pneg %p1603_p6 }
  0x2f   : > { %s180_s17 = sshll.u32 %s179_s7, 4  ;;  %s1230_s3 = scalar_lea.hbm %s1906_s0, 256  ;;  %s181_s17 = int_to_ptr.hbm [resolvable:$true] %s180_s17 }
  0x30   : > { %s1223_s6 = sshra.s32 %s181_s17, 4  ;;  %s1224_s6 = int_to_ptr.hbm [resolvable:$true] %s1223_s6 }
  0x31   : > { %s1225_s2 = scalar_lea.hbm %s1224_s6, 64 }
  0x32   : > { %p1226_p9 = scmp.ne.s32.totalorder %s1224_s6, %s1225_s2  ;;  %p1232_p7 = scmp.lt.s32.totalorder %s1230_s3, %s1225_s2 }
  0x34   : > { %p1228_p12 = pnand %p1227_p11, %p1226_p9 }
  0x36   : > { %p1229_p13 = pneg %p1228_p12 }
  0x38   : > { %p1234_p0 = pnand %p1232_p7, %p1229_p13 }
  0x3a   : > { %1237 = shalt.err (!%p1234_p0)
}
  0x3b   : > { %s1917_s11 = smov 128   ;;  %s1436_s6 = smov 8  }
  0x3c   : > { %1097 = dma.hbm_to_vmem [thread:$0]  (!%p1603_p6), %s181_s17, 1024, %s183_s19, %s163_s28, %s1917_s11, %s1917_s11, %s1436_s6  }
  0x3d   : > { %p945_p2 = scmp.ge.s32.totalorder %s1433_s22, 1  ;;  %p222_p9 = scmp.lt.s32.totalorder %s1433_s22, 7 }
  0x3e   : > { %p80_p12 = scmp.ge.s32.totalorder %s1425_s20, 2  ;;  %s930_s27 = sadd.s32 4294967294, %s1425_s20 }
  0x3f   : > { %p1622_p11 = pnand %p945_p2, %p222_p9  ;;  %p84_p13 = scmp.ge.s32.totalorder %s1965_s25, 2 }
  0x40   : > { %s1971_s27 = smov (!%p80_p12, %s930_s27), 0  ;;  %s931_s4 = sadd.s32 4294967294, %s1965_s25 }
  0x41   : > { %s1973_s4 = smov (!%p84_p13, %s931_s4), 0  ;;  %p102_p7 = scmp.ne.s32.totalorder %s1401_s14, %s1397_s13 }
  0x42   : > { %p108_p0 = scmp.ne.s32.totalorder %s1397_s13, %s1393_s12  ;;  %s89_s17 = ssub.s32 %s1971_s27, %s1973_s4 }
  0x43   : > { %s192_s19 = sand.u32 1, %s1401_s14   ;;  %s90_s15 = sor.u32 %s89_s17, %s1547_s30 }
  0x44   : > { %s95_s23 = sadd.s32 1, %s1401_s14  ;;  %p93_p6 = scmp.eq.s32.totalorder %s90_s15, 0 }
  0x45   : > { %p1639_p2 = por %p108_p0, %p1558_p8  ;;  %p104_p9 = por %p102_p7, %p65_p5 }
  0x46   : > { %s939_s26 = sshll.u32 %s192_s19, 8  ;;  %s1085_s2 = sshll.u32 %s1971_s27, 6 }
  0x47   : > { %s1646_s28 = scalar_select %p93_p6, %s1401_s14, %s95_s23  }
  0x48   : > { %s943_s9 = sshll.u32 %s1429_s21, 6  ;;  %s196_s24 = scalar_lea.vmem [#allocation5], %s939_s26 }
  0x49   : > { %s214_s12 = sshll.u32 %s196_s24, 4  ;;  %s209_s3 = sadd.s32 %s1085_s2, %s943_s9  ;;  %s215_s12 = int_to_ptr.vmem [resolvable:$true] %s214_s12 }
  0x4a   : > { %s944_s4 = sshll.u32 %s209_s3, 2  ;;  %p1651_p12 = pnand %p1105_p3, %p104_p9 }
  0x4b   : > { %s211_s15 = scalar_lea.hbm %s1907_s1, %s944_s4  ;;  %s193_s23 = scalar_lea.sflag [#allocation6], %s192_s19 }
  0x4c   : > { %s212_s11 = sshll.u32 %s211_s15, 4  ;;  %p1257_p8 = pneg %p1651_p12  ;;  %s213_s11 = int_to_ptr.hbm [resolvable:$true] %s212_s11 }
  0x4d   : > { %s1253_s27 = sshra.s32 %s213_s11, 4  ;;  %s1260_s24 = scalar_lea.hbm %s1907_s1, 512  ;;  %s1254_s27 = int_to_ptr.hbm [resolvable:$true] %s1253_s27 }
  0x4e   : > { %s1255_s26 = scalar_lea.hbm %s1254_s27, 256  ;;  %p1261_p7 = scmp.lt.s32.totalorder %s1254_s27, %s1907_s1 }
  0x4f   : > { %p1256_p5 = scmp.ne.s32.totalorder %s1254_s27, %s1255_s26  ;;  %p1262_p0 = scmp.lt.s32.totalorder %s1260_s24, %s1255_s26 }
  0x51   : > { %p1258_p13 = pnand %p1257_p8, %p1256_p5  ;;  %p1263_p6 = por %p1262_p0, %p1261_p7 }
  0x53   : > { %p1259_p3 = pneg %p1258_p13 }
  0x55   : > { %p1264_p9 = pnand %p1263_p6, %p1259_p3 }
  0x57   : > { %1267 = shalt.err (!%p1264_p9)
}
  0x58   : > { %s1938_s19 = smov 128   ;;  %226 = sbr.rel (%p1622_p11) target bundleno = 254 (0xfe), region = 28 }
  0x59   : > { %1100 = dma.hbm_to_vmem [thread:$0]  (!%p1651_p12), %s213_s11, 4096, %s215_s12, %s193_s23, %s1938_s19, %s1938_s19, %s1436_s6  }
  0x5a   : > { %s228_s4 = sand.u32 (!%p1622_p11), 1, %s1409_s16  }
  0x5b   : > { %s946_s17 = sshll.u32 (!%p1622_p11), %s228_s4, 6  ;;  %s229_s15 = scalar_lea.sflag (!%p1622_p11), [#allocation3], %s228_s4 }
  0x5c   : > { %s232_s2 = scalar_lea.vmem (!%p1622_p11), [#allocation2], %s946_s17 }
  0x5d   : > { %1368 = dma.done.wait (%p1567_p10), %s229_s15, 1024  }
  0x5e   : > { %1370 = vsyncadd (%p1567_p10), %s229_s15, 4294966272  ;;  %s238_s30 = sand.u32 1, %s1397_s13  }
  0x5f   : > { %s947_s27 = sshll.u32 %s238_s30, 8  ;;  %s239_s26 = scalar_lea.sflag [#allocation6], %s238_s30 }
  0x60   : > { %s1679_s11 = scalar_lea.vmem [#allocation5], %s947_s27 }
  0x61   : > { %1372 = dma.done.wait (%p1639_p2), %s239_s26, 4096  }
  0x62   : > { %1374 = vsyncadd (%p1639_p2), %s239_s26, 4294963200  ;;  %s266_s6 = sand.u32 1, %s1385_s10   ;;  %p949_p10 = scmp.ge.s32.totalorder %s1417_s18, 2 }
  0x63   : > { %s948_s7 = sshll.u32 %s266_s6, 6 }
  0x64   : > { %s1688_s12 = scalar_lea.vmem [#allocation7], %s948_s7  ;;  %283 = sbr.rel (%p949_p10) target bundleno = 114 (0x72), region = 40 }
  0x69   : > { %v284_v0 = vld [vmem:[%s232_s2] sm:$0xff]  ;;  %v285_v1 = vld [vmem:[%s232_s2 + $0x8] sm:$0xff]  ;;  %v286_v2 = vld [vmem:[%s232_s2 + $0x10] sm:$0xff] }
  0x6a   : > { %292 = vst [vmem:[%s1688_s12] sm:$0xff] %v284_v0  ;;  %v287_v3 = vld [vmem:[%s232_s2 + $0x18] sm:$0xff]  ;;  %v288_v4 = vld [vmem:[%s232_s2 + $0x20] sm:$0xff]  ;;  %v289_v5 = vld [vmem:[%s232_s2 + $0x28] sm:$0xff] }
  0x6b   : > { %293 = vst [vmem:[%s1688_s12 + $0x8] sm:$0xff] %v285_v1  ;;  %v290_v6 = vld [vmem:[%s232_s2 + $0x30] sm:$0xff]  ;;  %v291_v7 = vld [vmem:[%s232_s2 + $0x38] sm:$0xff] }
  0x6c   : > { %294 = vst [vmem:[%s1688_s12 + $0x10] sm:$0xff] %v286_v2 }
  0x6d   : > { %295 = vst [vmem:[%s1688_s12 + $0x18] sm:$0xff] %v287_v3 }
  0x6e   : > { %296 = vst [vmem:[%s1688_s12 + $0x20] sm:$0xff] %v288_v4 }
  0x6f   : > { %297 = vst [vmem:[%s1688_s12 + $0x28] sm:$0xff] %v289_v5 }
  0x70   : > { %298 = vst [vmem:[%s1688_s12 + $0x30] sm:$0xff] %v290_v6 }
  0x71   : > { %299 = vst [vmem:[%s1688_s12 + $0x38] sm:$0xff] %v291_v7 }
  0x72 PF: > { %p950_p11 = scmp.lt.s32.totalorder %s1417_s18, 2 }
  0x74   : > { %303 = sbr.rel (%p950_p11) target bundleno = 229 (0xe5), region = 44 }
  0x79   : > { %v304_v8 = vld [vmem:[%s1679_s11] ss:$4 sm:$0x3]  ;;  %v982_v9 = vld [vmem:[%s1679_s11 + $0x1] ss:$4 sm:$0x3] }
  0x7a   : > { %v431_v10 = vadd.f32 %v982_v9, %v304_v8  ;;  %v1014_v11 = vld [vmem:[%s1679_s11 + $0x2] ss:$4 sm:$0x3]  ;;  %v1046_v12 = vld [vmem:[%s1679_s11 + $0x3] ss:$4 sm:$0x3] }
  0x7b   : > { %v951_v13 = vld [vmem:[%s1679_s11 + $0x8] ss:$4 sm:$0x3]  ;;  %v983_v14 = vld [vmem:[%s1679_s11 + $0x9] ss:$4 sm:$0x3] }
  0x7c   : > { %v527_v15 = vadd.f32 %v1014_v11, %v431_v10  ;;  %v432_v16 = vadd.f32 %v983_v14, %v951_v13  ;;  %v1015_v17 = vld [vmem:[%s1679_s11 + $0xa] ss:$4 sm:$0x3]  ;;  %v1047_v18 = vld [vmem:[%s1679_s11 + $0xb] ss:$4 sm:$0x3] }
  0x7d   : > { %v952_v19 = vld [vmem:[%s1679_s11 + $0x10] ss:$4 sm:$0x3]  ;;  %v984_v20 = vld [vmem:[%s1679_s11 + $0x11] ss:$4 sm:$0x3] }
  0x7e   : > { %v623_v21 = vadd.f32 %v1046_v12, %v527_v15  ;;  %v528_v22 = vadd.f32 %v1015_v17, %v432_v16  ;;  %v433_v23 = vadd.f32 %v984_v20, %v952_v19  ;;  %v1016_v24 = vld [vmem:[%s1679_s11 + $0x12] ss:$4 sm:$0x3]  ;;  %v1048_v25 = vld [vmem:[%s1679_s11 + $0x13] ss:$4 sm:$0x3] }
  0x7f   : > { %v953_v26 = vld [vmem:[%s1679_s11 + $0x18] ss:$4 sm:$0x3]  ;;  %v985_v27 = vld [vmem:[%s1679_s11 + $0x19] ss:$4 sm:$0x3] }
  0x80   : > { %v655_v28 = vmul.f32 0.25, %v623_v21  ;;  %v624_v29 = vadd.f32 %v1047_v18, %v528_v22  ;;  %v529_v30 = vadd.f32 %v1016_v24, %v433_v23  ;;  %v434_v31 = vadd.f32 %v985_v27, %v953_v26  ;;  %v1017_v32 = vld [vmem:[%s1679_s11 + $0x1a] ss:$4 sm:$0x3] }
  0x81   : > { %v1049_v33 = vld [vmem:[%s1679_s11 + $0x1b] ss:$4 sm:$0x3]  ;;  %v954_v34 = vld [vmem:[%s1679_s11 + $0x20] ss:$4 sm:$0x3] }
  0x82   : > { %719 = vst [vmem:[#allocation1] ss:$4 sm:$0xff] %v655_v28  ;;  %v656_v35 = vmul.f32 0.25, %v624_v29  ;;  %v625_v36 = vadd.f32 %v1048_v25, %v529_v30  ;;  %v530_v37 = vadd.f32 %v1017_v32, %v434_v31  ;;  %v986_v38 = vld [vmem:[%s1679_s11 + $0x21] ss:$4 sm:$0x3] }
  0x83   : > { %v435_v39 = vadd.f32 %v986_v38, %v954_v34  ;;  %v1018_v40 = vld [vmem:[%s1679_s11 + $0x22] ss:$4 sm:$0x3]  ;;  %v1050_v41 = vld [vmem:[%s1679_s11 + $0x23] ss:$4 sm:$0x3] }
  0x84   : > { %721 = vst [vmem:[#allocation1 + $0x1] ss:$4 sm:$0xff] %v656_v35  ;;  %v657_v42 = vmul.f32 0.25, %v625_v36  ;;  %v626_v43 = vadd.f32 %v1049_v33, %v530_v37  ;;  %v955_v44 = vld [vmem:[%s1679_s11 + $0x28] ss:$4 sm:$0x3] }
  0x85   : > { %v531_v45 = vadd.f32 %v1018_v40, %v435_v39  ;;  %v987_v46 = vld [vmem:[%s1679_s11 + $0x29] ss:$4 sm:$0x3]  ;;  %v1019_v47 = vld [vmem:[%s1679_s11 + $0x2a] ss:$4 sm:$0x3] }
  0x86   : > { %723 = vst [vmem:[#allocation1 + $0x2] ss:$4 sm:$0xff] %v657_v42  ;;  %v658_v48 = vmul.f32 0.25, %v626_v43  ;;  %v436_v49 = vadd.f32 %v987_v46, %v955_v44  ;;  %v1051_v50 = vld [vmem:[%s1679_s11 + $0x2b] ss:$4 sm:$0x3] }
  0x87   : > { %v627_v51 = vadd.f32 %v1050_v41, %v531_v45  ;;  %v956_v52 = vld [vmem:[%s1679_s11 + $0x30] ss:$4 sm:$0x3]  ;;  %v988_v53 = vld [vmem:[%s1679_s11 + $0x31] ss:$4 sm:$0x3] }
  0x88   : > { %725 = vst [vmem:[#allocation1 + $0x3] ss:$4 sm:$0xff] %v658_v48  ;;  %v532_v54 = vadd.f32 %v1019_v47, %v436_v49  ;;  %v437_v55 = vadd.f32 %v988_v53, %v956_v52  ;;  %v1020_v56 = vld [vmem:[%s1679_s11 + $0x32] ss:$4 sm:$0x3] }
  0x89   : > { %v659_v57 = vmul.f32 0.25, %v627_v51  ;;  %v1052_v58 = vld [vmem:[%s1679_s11 + $0x33] ss:$4 sm:$0x3] }
  0x8a   : > { %v628_v59 = vadd.f32 %v1051_v50, %v532_v54  ;;  %v533_v60 = vadd.f32 %v1020_v56, %v437_v55  ;;  %v957_v61 = vld [vmem:[%s1679_s11 + $0x38] ss:$4 sm:$0x3]  ;;  %v989_v62 = vld [vmem:[%s1679_s11 + $0x39] ss:$4 sm:$0x3] }
  0x8b   : > { %728 = vst [vmem:[#allocation1 + $0x20] ss:$4 sm:$0xff] %v659_v57  ;;  %v438_v63 = vadd.f32 %v989_v62, %v957_v61  ;;  %v1021_v0 = vld [vmem:[%s1679_s11 + $0x3a] ss:$4 sm:$0x3] }
  0x8c   : > { %v660_v1 = vmul.f32 0.25, %v628_v59  ;;  %v629_v2 = vadd.f32 %v1052_v58, %v533_v60  ;;  %v1053_v3 = vld [vmem:[%s1679_s11 + $0x3b] ss:$4 sm:$0x3] }
  0x8d   : > { %v534_v4 = vadd.f32 %v1021_v0, %v438_v63  ;;  %v958_v5 = vld [vmem:[%s1679_s11 + $0x40] ss:$4 sm:$0x3]  ;;  %v990_v6 = vld [vmem:[%s1679_s11 + $0x41] ss:$4 sm:$0x3] }
  0x8e   : > { %730 = vst [vmem:[#allocation1 + $0x21] ss:$4 sm:$0xff] %v660_v1  ;;  %v661_v7 = vmul.f32 0.25, %v629_v2  ;;  %v439_v8 = vadd.f32 %v990_v6, %v958_v5  ;;  %v1022_v9 = vld [vmem:[%s1679_s11 + $0x42] ss:$4 sm:$0x3] }
  0x8f   : > { %v726_v10 = vld [vmem:[#allocation1] sm:$0xff]  ;;  %v630_v11 = vadd.f32 %v1053_v3, %v534_v4  ;;  %v1054_v12 = vld [vmem:[%s1679_s11 + $0x43] ss:$4 sm:$0x3] }
  0x90   : > { %774 = vst [vmem:[%s1688_s12] sm:$0xff] %v726_v10  ;;  %v535_v13 = vadd.f32 %v1022_v9, %v439_v8  ;;  %v959_v14 = vld [vmem:[%s1679_s11 + $0x48] ss:$4 sm:$0x3]  ;;  %v991_v15 = vld [vmem:[%s1679_s11 + $0x49] ss:$4 sm:$0x3] }
  0x91   : > { %732 = vst [vmem:[#allocation1 + $0x22] ss:$4 sm:$0xff] %v661_v7  ;;  %v662_v16 = vmul.f32 0.25, %v630_v11  ;;  %v440_v17 = vadd.f32 %v991_v15, %v959_v14  ;;  %v1023_v18 = vld [vmem:[%s1679_s11 + $0x4a] ss:$4 sm:$0x3] }
  0x92   : > { %v631_v19 = vadd.f32 %v1054_v12, %v535_v13  ;;  %v1055_v20 = vld [vmem:[%s1679_s11 + $0x4b] ss:$4 sm:$0x3]  ;;  %v960_v21 = vld [vmem:[%s1679_s11 + $0x50] ss:$4 sm:$0x3] }
  0x93   : > { %734 = vst [vmem:[#allocation1 + $0x23] ss:$4 sm:$0xff] %v662_v16  ;;  %v536_v22 = vadd.f32 %v1023_v18, %v440_v17  ;;  %v992_v23 = vld [vmem:[%s1679_s11 + $0x51] ss:$4 sm:$0x3] }
  0x94   : > { %v663_v24 = vmul.f32 0.25, %v631_v19  ;;  %v441_v25 = vadd.f32 %v992_v23, %v960_v21  ;;  %v1024_v26 = vld [vmem:[%s1679_s11 + $0x52] ss:$4 sm:$0x3] }
  0x95   : > { %v632_v27 = vadd.f32 %v1055_v20, %v536_v22  ;;  %v1056_v28 = vld [vmem:[%s1679_s11 + $0x53] ss:$4 sm:$0x3]  ;;  %v961_v29 = vld [vmem:[%s1679_s11 + $0x58] ss:$4 sm:$0x3] }
  0x96   : > { %736 = vst [vmem:[#allocation1] ss:$4 sm:$0xff] %v663_v24  ;;  %v537_v30 = vadd.f32 %v1024_v26, %v441_v25  ;;  %v993_v31 = vld [vmem:[%s1679_s11 + $0x59] ss:$4 sm:$0x3] }
  0x97   : > { %v664_v32 = vmul.f32 0.25, %v632_v27  ;;  %v442_v33 = vadd.f32 %v993_v31, %v961_v29  ;;  %v1025_v34 = vld [vmem:[%s1679_s11 + $0x5a] ss:$4 sm:$0x3] }
  0x98   : > { %v633_v35 = vadd.f32 %v1056_v28, %v537_v30  ;;  %v1057_v36 = vld [vmem:[%s1679_s11 + $0x5b] ss:$4 sm:$0x3]  ;;  %v962_v37 = vld [vmem:[%s1679_s11 + $0x60] ss:$4 sm:$0x3] }
  0x99   : > { %737 = vst [vmem:[#allocation1 + $0x1] ss:$4 sm:$0xff] %v664_v32  ;;  %v538_v38 = vadd.f32 %v1025_v34, %v442_v33  ;;  %v994_v39 = vld [vmem:[%s1679_s11 + $0x61] ss:$4 sm:$0x3] }
  0x9a   : > { %v735_v40 = vld [vmem:[#allocation1 + $0x20] sm:$0xff]  ;;  %v665_v41 = vmul.f32 0.25, %v633_v35  ;;  %v443_v42 = vadd.f32 %v994_v39, %v962_v37  ;;  %v1026_v43 = vld [vmem:[%s1679_s11 + $0x62] ss:$4 sm:$0x3] }
  0x9b   : > { %775 = vst [vmem:[%s1688_s12 + $0x8] sm:$0xff] %v735_v40  ;;  %v634_v44 = vadd.f32 %v1057_v36, %v538_v38  ;;  %v1058_v45 = vld [vmem:[%s1679_s11 + $0x63] ss:$4 sm:$0x3] }
  0x9c   : > { %738 = vst [vmem:[#allocation1 + $0x2] ss:$4 sm:$0xff] %v665_v41  ;;  %v539_v46 = vadd.f32 %v1026_v43, %v443_v42  ;;  %v963_v47 = vld [vmem:[%s1679_s11 + $0x68] ss:$4 sm:$0x3] }
  0x9d   : > { %v666_v48 = vmul.f32 0.25, %v634_v44  ;;  %v995_v49 = vld [vmem:[%s1679_s11 + $0x69] ss:$4 sm:$0x3] }
  0x9e   : > { %v635_v50 = vadd.f32 %v1058_v45, %v539_v46  ;;  %v444_v51 = vadd.f32 %v995_v49, %v963_v47  ;;  %v1027_v52 = vld [vmem:[%s1679_s11 + $0x6a] ss:$4 sm:$0x3]  ;;  %v1059_v53 = vld [vmem:[%s1679_s11 + $0x6b] ss:$4 sm:$0x3] }
  0x9f   : > { %739 = vst [vmem:[#allocation1 + $0x3] ss:$4 sm:$0xff] %v666_v48  ;;  %v964_v54 = vld [vmem:[%s1679_s11 + $0x70] ss:$4 sm:$0x3] }
  0xa0   : > { %v667_v55 = vmul.f32 0.25, %v635_v50  ;;  %v540_v56 = vadd.f32 %v1027_v52, %v444_v51  ;;  %v996_v57 = vld [vmem:[%s1679_s11 + $0x71] ss:$4 sm:$0x3] }
  0xa1   : > { %v445_v58 = vadd.f32 %v996_v57, %v964_v54  ;;  %v1028_v59 = vld [vmem:[%s1679_s11 + $0x72] ss:$4 sm:$0x3]  ;;  %v1060_v60 = vld [vmem:[%s1679_s11 + $0x73] ss:$4 sm:$0x3] }
  0xa2   : > { %741 = vst [vmem:[#allocation1 + $0x20] ss:$4 sm:$0xff] %v667_v55  ;;  %v636_v61 = vadd.f32 %v1059_v53, %v540_v56  ;;  %v965_v62 = vld [vmem:[%s1679_s11 + $0x78] ss:$4 sm:$0x3] }
  0xa3   : > { %v541_v63 = vadd.f32 %v1028_v59, %v445_v58  ;;  %v997_v0 = vld [vmem:[%s1679_s11 + $0x79] ss:$4 sm:$0x3]  ;;  %v1029_v1 = vld [vmem:[%s1679_s11 + $0x7a] ss:$4 sm:$0x3] }
  0xa4   : > { %v668_v2 = vmul.f32 0.25, %v636_v61  ;;  %v446_v3 = vadd.f32 %v997_v0, %v965_v62  ;;  %v1061_v4 = vld [vmem:[%s1679_s11 + $0x7b] ss:$4 sm:$0x3] }
  0xa5   : > { %v637_v5 = vadd.f32 %v1060_v60, %v541_v63  ;;  %v966_v6 = vld [vmem:[%s1679_s11 + $0x80] ss:$4 sm:$0x3]  ;;  %v998_v7 = vld [vmem:[%s1679_s11 + $0x81] ss:$4 sm:$0x3] }
  0xa6   : > { %742 = vst [vmem:[#allocation1 + $0x21] ss:$4 sm:$0xff] %v668_v2  ;;  %v542_v8 = vadd.f32 %v1029_v1, %v446_v3  ;;  %v447_v9 = vadd.f32 %v998_v7, %v966_v6  ;;  %v1030_v10 = vld [vmem:[%s1679_s11 + $0x82] ss:$4 sm:$0x3]  ;;  %v740_v11 = vld [vmem:[#allocation1] sm:$0xff] }
  0xa7   : > { %v669_v12 = vmul.f32 0.25, %v637_v5  ;;  %v1062_v13 = vld [vmem:[%s1679_s11 + $0x83] ss:$4 sm:$0x3]  ;;  %776 = vst [vmem:[%s1688_s12 + $0x10] sm:$0xff] %v740_v11 }
  0xa8   : > { %v638_v14 = vadd.f32 %v1061_v4, %v542_v8  ;;  %v543_v15 = vadd.f32 %v1030_v10, %v447_v9  ;;  %v967_v16 = vld [vmem:[%s1679_s11 + $0x88] ss:$4 sm:$0x3]  ;;  %v999_v17 = vld [vmem:[%s1679_s11 + $0x89] ss:$4 sm:$0x3] }
  0xa9   : > { %743 = vst [vmem:[#allocation1 + $0x22] ss:$4 sm:$0xff] %v669_v12  ;;  %v448_v18 = vadd.f32 %v999_v17, %v967_v16  ;;  %v1031_v19 = vld [vmem:[%s1679_s11 + $0x8a] ss:$4 sm:$0x3] }
  0xaa   : > { %v670_v20 = vmul.f32 0.25, %v638_v14  ;;  %v639_v21 = vadd.f32 %v1062_v13, %v543_v15  ;;  %v1063_v22 = vld [vmem:[%s1679_s11 + $0x8b] ss:$4 sm:$0x3] }
  0xab   : > { %v544_v23 = vadd.f32 %v1031_v19, %v448_v18  ;;  %v968_v24 = vld [vmem:[%s1679_s11 + $0x90] ss:$4 sm:$0x3]  ;;  %v1000_v25 = vld [vmem:[%s1679_s11 + $0x91] ss:$4 sm:$0x3] }
  0xac   : > { %744 = vst [vmem:[#allocation1 + $0x23] ss:$4 sm:$0xff] %v670_v20  ;;  %v671_v26 = vmul.f32 0.25, %v639_v21  ;;  %v449_v27 = vadd.f32 %v1000_v25, %v968_v24  ;;  %v1032_v28 = vld [vmem:[%s1679_s11 + $0x92] ss:$4 sm:$0x3] }
  0xad   : > { %v640_v29 = vadd.f32 %v1063_v22, %v544_v23  ;;  %v1064_v30 = vld [vmem:[%s1679_s11 + $0x93] ss:$4 sm:$0x3]  ;;  %v969_v31 = vld [vmem:[%s1679_s11 + $0x98] ss:$4 sm:$0x3] }
  0xae   : > { %746 = vst [vmem:[#allocation1] ss:$4 sm:$0xff] %v671_v26  ;;  %v545_v32 = vadd.f32 %v1032_v28, %v449_v27  ;;  %v1001_v33 = vld [vmem:[%s1679_s11 + $0x99] ss:$4 sm:$0x3] }
  0xaf   : > { %v672_v34 = vmul.f32 0.25, %v640_v29  ;;  %v450_v35 = vadd.f32 %v1001_v33, %v969_v31  ;;  %v1033_v36 = vld [vmem:[%s1679_s11 + $0x9a] ss:$4 sm:$0x3] }
  0xb0   : > { %v641_v37 = vadd.f32 %v1064_v30, %v545_v32  ;;  %v1065_v38 = vld [vmem:[%s1679_s11 + $0x9b] ss:$4 sm:$0x3]  ;;  %v970_v39 = vld [vmem:[%s1679_s11 + $0xa0] ss:$4 sm:$0x3] }
  0xb1   : > { %747 = vst [vmem:[#allocation1 + $0x1] ss:$4 sm:$0xff] %v672_v34  ;;  %v546_v40 = vadd.f32 %v1033_v36, %v450_v35  ;;  %v1002_v41 = vld [vmem:[%s1679_s11 + $0xa1] ss:$4 sm:$0x3] }
  0xb2   : > { %v673_v42 = vmul.f32 0.25, %v641_v37  ;;  %v451_v43 = vadd.f32 %v1002_v41, %v970_v39  ;;  %v1034_v44 = vld [vmem:[%s1679_s11 + $0xa2] ss:$4 sm:$0x3] }
  0xb3   : > { %v642_v45 = vadd.f32 %v1065_v38, %v546_v40  ;;  %v1066_v46 = vld [vmem:[%s1679_s11 + $0xa3] ss:$4 sm:$0x3]  ;;  %v745_v47 = vld [vmem:[#allocation1 + $0x20] sm:$0xff] }
  0xb4   : > { %748 = vst [vmem:[#allocation1 + $0x2] ss:$4 sm:$0xff] %v673_v42  ;;  %v547_v48 = vadd.f32 %v1034_v44, %v451_v43  ;;  %v971_v49 = vld [vmem:[%s1679_s11 + $0xa8] ss:$4 sm:$0x3] }
  0xb5   : > { %v674_v50 = vmul.f32 0.25, %v642_v45  ;;  %777 = vst [vmem:[%s1688_s12 + $0x18] sm:$0xff] %v745_v47  ;;  %v1003_v51 = vld [vmem:[%s1679_s11 + $0xa9] ss:$4 sm:$0x3] }
  0xb6   : > { %v643_v52 = vadd.f32 %v1066_v46, %v547_v48  ;;  %v452_v53 = vadd.f32 %v1003_v51, %v971_v49  ;;  %v1035_v54 = vld [vmem:[%s1679_s11 + $0xaa] ss:$4 sm:$0x3]  ;;  %v1067_v55 = vld [vmem:[%s1679_s11 + $0xab] ss:$4 sm:$0x3] }
  0xb7   : > { %749 = vst [vmem:[#allocation1 + $0x3] ss:$4 sm:$0xff] %v674_v50  ;;  %v972_v56 = vld [vmem:[%s1679_s11 + $0xb0] ss:$4 sm:$0x3] }
  0xb8   : > { %v675_v57 = vmul.f32 0.25, %v643_v52  ;;  %v548_v58 = vadd.f32 %v1035_v54, %v452_v53  ;;  %v1004_v59 = vld [vmem:[%s1679_s11 + $0xb1] ss:$4 sm:$0x3] }
  0xb9   : > { %v453_v60 = vadd.f32 %v1004_v59, %v972_v56  ;;  %v1036_v61 = vld [vmem:[%s1679_s11 + $0xb2] ss:$4 sm:$0x3]  ;;  %v1068_v62 = vld [vmem:[%s1679_s11 + $0xb3] ss:$4 sm:$0x3] }
  0xba   : > { %751 = vst [vmem:[#allocation1 + $0x20] ss:$4 sm:$0xff] %v675_v57  ;;  %v644_v63 = vadd.f32 %v1067_v55, %v548_v58  ;;  %v973_v0 = vld [vmem:[%s1679_s11 + $0xb8] ss:$4 sm:$0x3] }
  0xbb   : > { %v549_v1 = vadd.f32 %v1036_v61, %v453_v60  ;;  %v1005_v2 = vld [vmem:[%s1679_s11 + $0xb9] ss:$4 sm:$0x3]  ;;  %v1037_v3 = vld [vmem:[%s1679_s11 + $0xba] ss:$4 sm:$0x3] }
  0xbc   : > { %v676_v4 = vmul.f32 0.25, %v644_v63  ;;  %v454_v5 = vadd.f32 %v1005_v2, %v973_v0  ;;  %v1069_v6 = vld [vmem:[%s1679_s11 + $0xbb] ss:$4 sm:$0x3] }
  0xbd   : > { %v645_v7 = vadd.f32 %v1068_v62, %v549_v1  ;;  %v974_v8 = vld [vmem:[%s1679_s11 + $0xc0] ss:$4 sm:$0x3]  ;;  %v1006_v9 = vld [vmem:[%s1679_s11 + $0xc1] ss:$4 sm:$0x3] }
  0xbe   : > { %752 = vst [vmem:[#allocation1 + $0x21] ss:$4 sm:$0xff] %v676_v4  ;;  %v550_v10 = vadd.f32 %v1037_v3, %v454_v5  ;;  %v455_v11 = vadd.f32 %v1006_v9, %v974_v8  ;;  %v1038_v12 = vld [vmem:[%s1679_s11 + $0xc2] ss:$4 sm:$0x3]  ;;  %v750_v13 = vld [vmem:[#allocation1] sm:$0xff] }
  0xbf   : > { %v677_v14 = vmul.f32 0.25, %v645_v7  ;;  %v1070_v15 = vld [vmem:[%s1679_s11 + $0xc3] ss:$4 sm:$0x3]  ;;  %778 = vst [vmem:[%s1688_s12 + $0x20] sm:$0xff] %v750_v13 }
  0xc0   : > { %v646_v16 = vadd.f32 %v1069_v6, %v550_v10  ;;  %v551_v17 = vadd.f32 %v1038_v12, %v455_v11  ;;  %v975_v18 = vld [vmem:[%s1679_s11 + $0xc8] ss:$4 sm:$0x3]  ;;  %v1007_v19 = vld [vmem:[%s1679_s11 + $0xc9] ss:$4 sm:$0x3] }
  0xc1   : > { %753 = vst [vmem:[#allocation1 + $0x22] ss:$4 sm:$0xff] %v677_v14  ;;  %v456_v20 = vadd.f32 %v1007_v19, %v975_v18  ;;  %v1039_v21 = vld [vmem:[%s1679_s11 + $0xca] ss:$4 sm:$0x3] }
  0xc2   : > { %v678_v22 = vmul.f32 0.25, %v646_v16  ;;  %v647_v23 = vadd.f32 %v1070_v15, %v551_v17  ;;  %v1071_v24 = vld [vmem:[%s1679_s11 + $0xcb] ss:$4 sm:$0x3] }
  0xc3   : > { %v552_v25 = vadd.f32 %v1039_v21, %v456_v20  ;;  %v976_v26 = vld [vmem:[%s1679_s11 + $0xd0] ss:$4 sm:$0x3]  ;;  %v1008_v27 = vld [vmem:[%s1679_s11 + $0xd1] ss:$4 sm:$0x3] }
  0xc4   : > { %754 = vst [vmem:[#allocation1 + $0x23] ss:$4 sm:$0xff] %v678_v22  ;;  %v679_v28 = vmul.f32 0.25, %v647_v23  ;;  %v457_v29 = vadd.f32 %v1008_v27, %v976_v26  ;;  %v1040_v30 = vld [vmem:[%s1679_s11 + $0xd2] ss:$4 sm:$0x3] }
  0xc5   : > { %v648_v31 = vadd.f32 %v1071_v24, %v552_v25  ;;  %v1072_v32 = vld [vmem:[%s1679_s11 + $0xd3] ss:$4 sm:$0x3]  ;;  %v977_v33 = vld [vmem:[%s1679_s11 + $0xd8] ss:$4 sm:$0x3] }
  0xc6   : > { %756 = vst [vmem:[#allocation1] ss:$4 sm:$0xff] %v679_v28  ;;  %v553_v34 = vadd.f32 %v1040_v30, %v457_v29  ;;  %v1009_v35 = vld [vmem:[%s1679_s11 + $0xd9] ss:$4 sm:$0x3] }
  0xc7   : > { %v680_v36 = vmul.f32 0.25, %v648_v31  ;;  %v458_v37 = vadd.f32 %v1009_v35, %v977_v33  ;;  %v1041_v38 = vld [vmem:[%s1679_s11 + $0xda] ss:$4 sm:$0x3] }
  0xc8   : > { %v649_v39 = vadd.f32 %v1072_v32, %v553_v34  ;;  %v1073_v40 = vld [vmem:[%s1679_s11 + $0xdb] ss:$4 sm:$0x3]  ;;  %v978_v41 = vld [vmem:[%s1679_s11 + $0xe0] ss:$4 sm:$0x3] }
  0xc9   : > { %757 = vst [vmem:[#allocation1 + $0x1] ss:$4 sm:$0xff] %v680_v36  ;;  %v554_v42 = vadd.f32 %v1041_v38, %v458_v37  ;;  %v1010_v43 = vld [vmem:[%s1679_s11 + $0xe1] ss:$4 sm:$0x3] }
  0xca   : > { %v681_v44 = vmul.f32 0.25, %v649_v39  ;;  %v459_v45 = vadd.f32 %v1010_v43, %v978_v41  ;;  %v1042_v46 = vld [vmem:[%s1679_s11 + $0xe2] ss:$4 sm:$0x3] }
  0xcb   : > { %v650_v47 = vadd.f32 %v1073_v40, %v554_v42  ;;  %v1074_v48 = vld [vmem:[%s1679_s11 + $0xe3] ss:$4 sm:$0x3]  ;;  %v755_v49 = vld [vmem:[#allocation1 + $0x20] sm:$0xff] }
  0xcc   : > { %758 = vst [vmem:[#allocation1 + $0x2] ss:$4 sm:$0xff] %v681_v44  ;;  %v555_v50 = vadd.f32 %v1042_v46, %v459_v45  ;;  %v979_v51 = vld [vmem:[%s1679_s11 + $0xe8] ss:$4 sm:$0x3] }
  0xcd   : > { %v682_v52 = vmul.f32 0.25, %v650_v47  ;;  %779 = vst [vmem:[%s1688_s12 + $0x28] sm:$0xff] %v755_v49  ;;  %v1011_v53 = vld [vmem:[%s1679_s11 + $0xe9] ss:$4 sm:$0x3] }
  0xce   : > { %v651_v54 = vadd.f32 %v1074_v48, %v555_v50  ;;  %v460_v55 = vadd.f32 %v1011_v53, %v979_v51  ;;  %v1043_v56 = vld [vmem:[%s1679_s11 + $0xea] ss:$4 sm:$0x3]  ;;  %v1075_v57 = vld [vmem:[%s1679_s11 + $0xeb] ss:$4 sm:$0x3] }
  0xcf   : > { %759 = vst [vmem:[#allocation1 + $0x3] ss:$4 sm:$0xff] %v682_v52  ;;  %v980_v58 = vld [vmem:[%s1679_s11 + $0xf0] ss:$4 sm:$0x3] }
  0xd0   : > { %v683_v59 = vmul.f32 0.25, %v651_v54  ;;  %v556_v60 = vadd.f32 %v1043_v56, %v460_v55  ;;  %v1012_v61 = vld [vmem:[%s1679_s11 + $0xf1] ss:$4 sm:$0x3] }
  0xd1   : > { %v461_v62 = vadd.f32 %v1012_v61, %v980_v58  ;;  %v1044_v63 = vld [vmem:[%s1679_s11 + $0xf2] ss:$4 sm:$0x3]  ;;  %v1076_v0 = vld [vmem:[%s1679_s11 + $0xf3] ss:$4 sm:$0x3] }
  0xd2   : > { %761 = vst [vmem:[#allocation1 + $0x20] ss:$4 sm:$0xff] %v683_v59  ;;  %v652_v1 = vadd.f32 %v1075_v57, %v556_v60  ;;  %v981_v2 = vld [vmem:[%s1679_s11 + $0xf8] ss:$4 sm:$0x3] }
  0xd3   : > { %v557_v3 = vadd.f32 %v1044_v63, %v461_v62  ;;  %v1013_v4 = vld [vmem:[%s1679_s11 + $0xf9] ss:$4 sm:$0x3]  ;;  %v1045_v5 = vld [vmem:[%s1679_s11 + $0xfa] ss:$4 sm:$0x3] }
  0xd4   : > { %v684_v6 = vmul.f32 0.25, %v652_v1  ;;  %v462_v7 = vadd.f32 %v1013_v4, %v981_v2  ;;  %v1077_v9 = vld [vmem:[%s1679_s11 + $0xfb] ss:$4 sm:$0x3] }
  0xd5   : > { %v653_v8 = vadd.f32 %v1076_v0, %v557_v3 }
  0xd6   : > { %762 = vst [vmem:[#allocation1 + $0x21] ss:$4 sm:$0xff] %v684_v6  ;;  %v558_v10 = vadd.f32 %v1045_v5, %v462_v7  ;;  %v760_v11 = vld [vmem:[#allocation1] sm:$0xff] }
  0xd7   : > { %v685_v12 = vmul.f32 0.25, %v653_v8  ;;  %780 = vst [vmem:[%s1688_s12 + $0x30] sm:$0xff] %v760_v11 }
  0xd8   : > { %v654_v13 = vadd.f32 %v1077_v9, %v558_v10 }
  0xd9   : > { %763 = vst [vmem:[#allocation1 + $0x22] ss:$4 sm:$0xff] %v685_v12 }
  0xda   : > { %v686_v14 = vmul.f32 0.25, %v654_v13 }
  0xdc   : > { %764 = vst [vmem:[#allocation1 + $0x23] ss:$4 sm:$0xff] %v686_v14 }
  0xe3   : > { %v765_v15 = vld [vmem:[#allocation1 + $0x20] sm:$0xff] }
  0xe4   : > { %781 = vst [vmem:[%s1688_s12 + $0x38] sm:$0xff] %v765_v15 }
  0xe5 PF: > { %s1939_s8 = sld [smem:[#allocation14_spill]]  ;;  %s1086_s23 = sshll.u32 %s1417_s18, 4 }
  0xe6   : > { %s800_s24 = sshll.u32 %s1688_s12, 4  ;;  %s1941_s17 = sld [smem:[#allocation20_spill]]  ;;  %s801_s24 = int_to_ptr.vmem [resolvable:$true] %s800_s24 }
  0xe7   : > { %s783_s27 = scalar_lea.sflag [#allocation4], %s266_s6 }
  0xeb   : > { %s1087_s9 = smul.u32 48, %s1939_s8 }
  0xec   : > { %s1942_s2 = smov %s1941_s17 }
  0xed   : > { %s797_s3 = sadd.s32 %s1087_s9, %s1086_s23  ;;  %s1303_s12 = scalar_lea.hbm %s1942_s2, 384 }
  0xee   : > { %s1081_s5 = sshll.u32 %s797_s3, 2 }
  0xef   : > { %s799_s15 = scalar_lea.hbm %s1941_s17, %s1081_s5 }
  0xf0   : > { %s802_s30 = sshll.u32 %s799_s15, 4  ;;  %s803_s30 = int_to_ptr.hbm [resolvable:$true] %s802_s30 }
  0xf1   : > { %s1297_s26 = sshra.s32 %s803_s30, 4  ;;  %s1298_s26 = int_to_ptr.hbm [resolvable:$true] %s1297_s26 }
  0xf2   : > { %s1299_s11 = scalar_lea.hbm %s1298_s26, 64  ;;  %p1304_p8 = scmp.lt.s32.totalorder %s1298_s26, %s1942_s2 }
  0xf3   : > { %p1300_p2 = scmp.ne.s32.totalorder %s1298_s26, %s1299_s11  ;;  %p1305_p13 = scmp.lt.s32.totalorder %s1303_s12, %s1299_s11 }
  0xf5   : > { %p1301_p12 = pnand %p1300_p2, %p1585_p1  ;;  %p1306_p3 = por %p1305_p13, %p1304_p8 }
  0xf7   : > { %p1302_p5 = pneg %p1301_p12 }
  0xf9   : > { %p1307_p7 = pnand %p1306_p3, %p1302_p5 }
  0xfb   : > { %1310 = shalt.err (!%p1307_p7)
}
  0xfc   : > { %s1437_s6 = smov 128   ;;  %s1438_s9 = smov 8  }
  0xfd   : > { %1092 = dma.vmem_to_hbm [thread:$0]  (%p1585_p1), %s801_s24, 1024, %s803_s30, %s783_s27, %s1437_s6, %s1437_s6, %s1438_s9  }
  0xfe PF: > { %s1943_s3 = sld [smem:[#allocation11_spill]]  ;;  %p1106_p0 = scmp.ge.s32.totalorder %s1433_s22, 2 }
 0x100   : > { %p1102_p6 = pnand %p1106_p0, %p1592_p4 }
 0x102   : > { %p1103_p9 = pneg %p1102_p6 }
 0x104   : > { %s817_s19 = sand.u32 1, %s1943_s3  }
 0x105   : > { %s818_s4 = scalar_lea.sflag [#allocation4], %s817_s19 }
 0x106   : > { %1376 = dma.done.wait (%p1103_p9), %s818_s4, 1024  }
 0x107   : > { %1378 = vsyncadd (%p1103_p9), %s818_s4, 4294966272  ;;  %s21_s22 = sadd.s32 1, %s1433_s22   ;;  %s1946_s29 = sld [smem:[#allocation12_spill]] }
 0x108   : > { %p1859_p10 = scmp.ge.s32.totalorder %s21_s22, 8   ;;  %s1947_s11 = sld [smem:[#allocation17_spill]] }
 0x109   : > { %s1948_s24 = sld [smem:[#allocation13_spill]]  ;;  %s1952_s9 = smov %s1385_s10 }
 0x10a   : > { %s1949_s30 = sld [smem:[#allocation16_spill]]  ;;  %s1954_s12 = smov %s1397_s13 }
 0x10b   : > { %s1950_s27 = sld [smem:[#allocation15_spill]]  ;;  %s1955_s13 = smov %s1401_s14 }
 0x10c   : > { %s1956_s14 = smov %s1646_s28  ;;  %s1957_s15 = smov %s1409_s16 }
 0x10d   : > { %s1953_s10 = smov %s1946_s29  ;;  %s1960_s18 = smov %s1425_s20 }
 0x10e   : > { %s1961_s19 = smov %s1429_s21  ;;  %s1962_s20 = smov %s1965_s25 }
 0x10f   : > { %s1958_s16 = smov %s1948_s24  ;;  %20 = sbr.rel (!%p1859_p10) target bundleno = 14 (0xe), region = 228 }
 0x110   : > { %s1959_s17 = smov %s1949_s30 }
 0x111   : > { %s1963_s21 = smov %s1950_s27 }
 0x114   :  { %824 = vsyncpa [#allocation3], 1 }
 0x115   :  { %826 = vsyncpa [#allocation3 + $0x1], 1 }
 0x116   :  { %827 = vsyncpa [#allocation6], 1 }
 0x117   :  { %829 = vsyncpa [#allocation6 + $0x1], 1 }
 0x118   :  { %830 = vsyncpa [#allocation4], 1 }
 0x119   :  { %832 = vsyncpa [#allocation4 + $0x1], 1 }

</bundles_post_ra>
